<compile_context>
chip_gen: v5e
topology: v5e:2x2
jax: 0.10.0
libtpu: 0.0.40
codegen_flags: <defaults>
</compile_context>

<pallas_src>
import math
import functools

import jax
import jax.numpy as jnp
from jax.experimental import pallas as pl
from jax.experimental.pallas import tpu as pltpu


def _pair(v):
    return (v, v) if isinstance(v, int) else tuple(v)


def _round_up(v, m):
    return -(-v // m) * m


def _conv_untied_bias_kernel(x_ref, w_ref, b_ref, o_ref, *, taps, Mp):
    # x_ref: (1, P, Cin_p, L)   flattened (phase-decomposed) zero-padded image
    # w_ref: (Cout, Kp)         im2col-folded weight, Kp = KH*KW*Cin_p
    # b_ref: (Cout, Mp)         untied bias laid out exactly like the output slab
    # o_ref: (1, Cout, Mp)      lane-dense output slab (Mp multiple of 128)
    slabs = []
    for (p, off) in taps:                               # static python loop over KH*KW taps
        slabs.append(x_ref[0, p, :, pl.ds(off, Mp)])    # (Cin_p, Mp) contiguous lane-dense vld
    patches = jnp.concatenate(slabs, axis=0)            # (Kp, Mp): sublane-tile-aligned concat
    w = w_ref[...]                                      # (Cout, Kp), already mxu_dtype
    patches = patches.astype(w.dtype)                   # bf16 MXU inputs by default
    # Single MXU matmul per grid step; lane dim of the result is Mp (>=128, unmasked).
    acc = jnp.dot(w, patches, preferred_element_type=jnp.float32)     # (Cout, Mp) f32
    o_ref[0] = (acc + b_ref[...].astype(jnp.float32)).astype(o_ref.dtype)


def conv2d_untied_bias(x, weight, bias, stride=1, padding=0, dilation=1,
                       groups=1, mxu_dtype=jnp.bfloat16):
    """Forward pass of Conv2dUntiedBias. x: (N,Cin,H,W) NCHW. Returns NCHW output."""
    if groups != 1:
        # TODO(synk): grouped convolution not implemented in this kernel.
        raise NotImplementedError("groups != 1 not supported")
    sh, sw = _pair(stride)
    ph, pw = _pair(padding)
    dh, dw = _pair(dilation)

    N, Cin, H, W = x.shape
    O, Cin_w, KH, KW = weight.shape
    assert Cin_w == Cin
    Ho = (H + 2 * ph - dh * (KH - 1) - 1) // sh + 1
    Wo = (W + 2 * pw - dw * (KW - 1) - 1) // sw + 1
    assert bias.shape == (O, Ho, Wo), (bias.shape, (O, Ho, Wo))

    # --- space-to-depth phase decomposition: every tap becomes a stride-1 window.
    qh_max = (dh * (KH - 1)) // sh
    qw_max = (dw * (KW - 1)) // sw
    Hs, Ws = qh_max + Ho, qw_max + Wo              # per-phase window extent
    P = sh * sw                                    # number of phases (1 for stride 1)

    Cin_p = _round_up(Cin, 8)                      # sublane-aligned channel pad
    Mp = _round_up(Ho * Ws, 128)                   # lane-dense M (garbage cols at row ends)
    L = _round_up(max(Hs * Ws, qh_max * Ws + qw_max + Mp), 128)   # flat length incl. over-read

    Hp2 = _round_up(max(H + 2 * ph, Hs * sh), sh)
    Wp2 = _round_up(max(W + 2 * pw, Ws * sw), sw)
    # No NHWC transpose: keep NCHW, pad channels + spatial, then phase-decompose + flatten.
    x_pad = jnp.pad(x, ((0, 0), (0, Cin_p - Cin),
                        (ph, Hp2 - H - ph), (pw, Wp2 - W - pw)))
    xr = x_pad.reshape(N, Cin_p, Hp2 // sh, sh, Wp2 // sw, sw)
    xr = jnp.transpose(xr, (0, 3, 5, 1, 2, 4))[:, :, :, :, :Hs, :Ws]   # (N,sh,sw,Cin_p,Hs,Ws)
    x_flat = jnp.pad(xr.reshape(N, P, Cin_p, Hs * Ws),
                     ((0, 0), (0, 0), (0, 0), (0, L - Hs * Ws)))       # (N,P,Cin_p,L)

    # --- weight folded (Cout, Kp); K order = (ki, kj, cin_p) matching patch assembly.
    Kp = KH * KW * Cin_p
    w2d = jnp.pad(weight, ((0, 0), (0, Cin_p - Cin), (0, 0), (0, 0)))
    w2d = jnp.transpose(w2d, (0, 2, 3, 1)).reshape(O, Kp)
    if mxu_dtype is not None:
        w2d = w2d.astype(mxu_dtype)

    # --- bias laid out like the kernel output slab: (Cout, Mp), garbage cols zeroed.
    b2d = jnp.pad(bias, ((0, 0), (0, 0), (0, Ws - Wo))).reshape(O, Ho * Ws)
    b2d = jnp.pad(b2d, ((0, 0), (0, Mp - Ho * Ws)))

    # --- static tap table: (phase index, flat offset) for each (ki, kj).
    taps = []
    for ki in range(KH):
        for kj in range(KW):
            a, b = ki * dh, kj * dw
            taps.append(((a % sh) * sw + (b % sw), (a // sh) * Ws + (b // sw)))
    taps = tuple(taps)

    kernel = functools.partial(_conv_untied_bias_kernel, taps=taps, Mp=Mp)

    # Explicit VMEM budget: double-buffered blocks + headroom for patches/output vregs.
    esz = x.dtype.itemsize
    block_bytes = (P * Cin_p * L * esz + O * Kp * w2d.dtype.itemsize
                   + O * Mp * b2d.dtype.itemsize + O * Mp * esz)
    vmem_limit = int(min(64 * 2**20, max(8 * 2**20, 4 * block_bytes)))

    cost = pl.CostEstimate(
        flops=2 * N * O * Ho * Wo * KH * KW * Cin,
        transcendentals=0,
        bytes_accessed=int(x_flat.size * esz + w2d.size * w2d.dtype.itemsize
                           + b2d.size * b2d.dtype.itemsize + N * O * Mp * esz))

    out = pl.pallas_call(
        kernel,
        out_shape=jax.ShapeDtypeStruct((N, O, Mp), x.dtype),
        grid_spec=pltpu.PrefetchScalarGridSpec(
            num_scalar_prefetch=0,
            grid=(N,),                                         # >=2 parallel steps for N>=2
            in_specs=[
                pl.BlockSpec((1, P, Cin_p, L), lambda n: (n, 0, 0, 0)),
                pl.BlockSpec((O, Kp), lambda n: (0, 0)),
                pl.BlockSpec((O, Mp), lambda n: (0, 0)),
            ],
            out_specs=pl.BlockSpec((1, O, Mp), lambda n: (n, 0, 0)),
        ),
        compiler_params=pltpu.CompilerParams(
            dimension_semantics=("parallel",),
            vmem_limit_bytes=vmem_limit),
        cost_estimate=cost,
    )(x_flat, w2d, b2d)

    # (N, O, Mp) -> drop over-read tail and garbage right-edge columns -> NCHW.
    out = out[:, :, :Ho * Ws].reshape(N, O, Ho, Ws)[:, :, :, :Wo]
    return out


if __name__ == "__main__":
    # Module config: height=16, width=16 (output spatial), in_channels=4,
    # out_channels=8, kernel_size=3, stride=1, padding=1 -> Ho = Wo = 16.
    N, Cin, H, W = 2, 4, 16, 16
    O, KH, KW = 8, 3, 3
    stride, padding, dilation, groups = 1, 1, 1, 1
    Ho, Wo = 16, 16

    key = jax.random.PRNGKey(0)
    kx, kw, kb = jax.random.split(key, 3)

    # reset_parameters(): uniform(-stdv, stdv), stdv = 1/sqrt(Cin*KH*KW)
    stdv = 1.0 / math.sqrt(Cin * KH * KW)
    weight = jax.random.uniform(kw, (O, Cin, KH, KW), jnp.float32,
                                minval=-stdv, maxval=stdv)
    bias = jax.random.uniform(kb, (O, Ho, Wo), jnp.float32,
                              minval=-stdv, maxval=stdv)
    x = jax.random.normal(kx, (N, Cin, H, W), jnp.float32)

    ref = jax.lax.conv_general_dilated(
        x, weight, window_strides=(stride, stride),
        padding=[(padding, padding), (padding, padding)],
        rhs_dilation=(dilation, dilation),
        dimension_numbers=("NCHW", "OIHW", "NCHW"),
        feature_group_count=groups) + bias[None]

    # Default path: bf16 MXU inputs with f32 accumulation.  Tolerance is looser
    # by design (documented accuracy tradeoff of the bf16 default).
    out = jax.block_until_ready(conv2d_untied_bias(
        x, weight, bias, stride=stride, padding=padding,
        dilation=dilation, groups=groups))
    assert out.shape == (N, O, Ho, Wo)
    assert jnp.allclose(out, ref, atol=3e-2, rtol=3e-2), "bf16 path mismatch vs reference"

    # f32 escape hatch: tight tolerance.
    out_f32 = jax.block_until_ready(conv2d_untied_bias(
        x, weight, bias, stride=stride, padding=padding,
        dilation=dilation, groups=groups, mxu_dtype=None))
    assert jnp.allclose(out_f32, ref, atol=1e-3, rtol=1e-3), "f32 path mismatch vs reference"

    print("KERNEL_OK")
</pallas_src>

<mosaic_0001>
module attributes {stable_mosaic.version = 11 : i64} {
  func.func @_conv_untied_bias_kernel(%arg0: i32, %arg1: memref<1x1x8x512xf32, #tpu.memory_space<vmem>>, %arg2: memref<8x72xbf16, #tpu.memory_space<vmem>>, %arg3: memref<8x384xf32, #tpu.memory_space<vmem>>, %arg4: memref<1x8x384xf32, #tpu.memory_space<vmem>>) attributes {dimension_semantics = [#tpu.dimension_semantics<parallel>], iteration_bounds = array<i64: 2>, scalar_prefetch = 0 : i64, scratch_operands = 0 : i64, tpu.core_type = #tpu.core_type<tc>, window_params = [{transform_indices = @transform_0, window_bounds = array<i64: 1, 1, 8, 512>}, {pipeline_mode = #tpu.pipeline_mode<synchronous>, transform_indices = @transform_1, window_bounds = array<i64: 8, 72>}, {pipeline_mode = #tpu.pipeline_mode<synchronous>, transform_indices = @transform_2, window_bounds = array<i64: 8, 384>}, {transform_indices = @transform_3, window_bounds = array<i64: 1, 8, 384>}]} {
    %c0 = arith.constant 0 : index
    %c0_0 = arith.constant 0 : index
    %c0_1 = arith.constant 0 : index
    %c0_2 = arith.constant 0 : index
    %0 = vector.load %arg1[%c0, %c0_0, %c0_1, %c0_2] : memref<1x1x8x512xf32, #tpu.memory_space<vmem>>, vector<1x1x8x384xf32>
    %1 = vector.shape_cast %0 : vector<1x1x8x384xf32> to vector<8x384xf32>
    %c0_3 = arith.constant 0 : index
    %c0_4 = arith.constant 0 : index
    %c0_5 = arith.constant 0 : index
    %c1 = arith.constant 1 : index
    %2 = vector.load %arg1[%c0_3, %c0_4, %c0_5, %c1] : memref<1x1x8x512xf32, #tpu.memory_space<vmem>>, vector<1x1x8x384xf32>
    %3 = vector.shape_cast %2 : vector<1x1x8x384xf32> to vector<8x384xf32>
    %c0_6 = arith.constant 0 : index
    %c0_7 = arith.constant 0 : index
    %c0_8 = arith.constant 0 : index
    %c2 = arith.constant 2 : index
    %4 = vector.load %arg1[%c0_6, %c0_7, %c0_8, %c2] : memref<1x1x8x512xf32, #tpu.memory_space<vmem>>, vector<1x1x8x384xf32>
    %5 = vector.shape_cast %4 : vector<1x1x8x384xf32> to vector<8x384xf32>
    %c0_9 = arith.constant 0 : index
    %c0_10 = arith.constant 0 : index
    %c0_11 = arith.constant 0 : index
    %c18 = arith.constant 18 : index
    %6 = vector.load %arg1[%c0_9, %c0_10, %c0_11, %c18] : memref<1x1x8x512xf32, #tpu.memory_space<vmem>>, vector<1x1x8x384xf32>
    %7 = vector.shape_cast %6 : vector<1x1x8x384xf32> to vector<8x384xf32>
    %c0_12 = arith.constant 0 : index
    %c0_13 = arith.constant 0 : index
    %c0_14 = arith.constant 0 : index
    %c19 = arith.constant 19 : index
    %8 = vector.load %arg1[%c0_12, %c0_13, %c0_14, %c19] : memref<1x1x8x512xf32, #tpu.memory_space<vmem>>, vector<1x1x8x384xf32>
    %9 = vector.shape_cast %8 : vector<1x1x8x384xf32> to vector<8x384xf32>
    %c0_15 = arith.constant 0 : index
    %c0_16 = arith.constant 0 : index
    %c0_17 = arith.constant 0 : index
    %c20 = arith.constant 20 : index
    %10 = vector.load %arg1[%c0_15, %c0_16, %c0_17, %c20] : memref<1x1x8x512xf32, #tpu.memory_space<vmem>>, vector<1x1x8x384xf32>
    %11 = vector.shape_cast %10 : vector<1x1x8x384xf32> to vector<8x384xf32>
    %c0_18 = arith.constant 0 : index
    %c0_19 = arith.constant 0 : index
    %c0_20 = arith.constant 0 : index
    %c36 = arith.constant 36 : index
    %12 = vector.load %arg1[%c0_18, %c0_19, %c0_20, %c36] : memref<1x1x8x512xf32, #tpu.memory_space<vmem>>, vector<1x1x8x384xf32>
    %13 = vector.shape_cast %12 : vector<1x1x8x384xf32> to vector<8x384xf32>
    %c0_21 = arith.constant 0 : index
    %c0_22 = arith.constant 0 : index
    %c0_23 = arith.constant 0 : index
    %c37 = arith.constant 37 : index
    %14 = vector.load %arg1[%c0_21, %c0_22, %c0_23, %c37] : memref<1x1x8x512xf32, #tpu.memory_space<vmem>>, vector<1x1x8x384xf32>
    %15 = vector.shape_cast %14 : vector<1x1x8x384xf32> to vector<8x384xf32>
    %c0_24 = arith.constant 0 : index
    %c0_25 = arith.constant 0 : index
    %c0_26 = arith.constant 0 : index
    %c38 = arith.constant 38 : index
    %16 = vector.load %arg1[%c0_24, %c0_25, %c0_26, %c38] : memref<1x1x8x512xf32, #tpu.memory_space<vmem>>, vector<1x1x8x384xf32>
    %17 = vector.shape_cast %16 : vector<1x1x8x384xf32> to vector<8x384xf32>
    %18 = tpu.concatenate %1, %3, %5, %7, %9, %11, %13, %15, %17 in 0 : vector<8x384xf32>, vector<8x384xf32>, vector<8x384xf32>, vector<8x384xf32>, vector<8x384xf32>, vector<8x384xf32>, vector<8x384xf32>, vector<8x384xf32>, vector<8x384xf32> -> vector<72x384xf32>
    %c0_27 = arith.constant 0 : index
    %c0_28 = arith.constant 0 : index
    %19 = vector.load %arg2[%c0_27, %c0_28] : memref<8x72xbf16, #tpu.memory_space<vmem>>, vector<8x72xbf16>
    %20 = arith.truncf %18 : vector<72x384xf32> to vector<72x384xbf16>
    %cst = arith.constant dense<0.000000e+00> : vector<8x384xf32>
    %21 = tpu.matmul %19, %20, %cst {dimension_numbers = #tpu.dot_dimension_numbers<[1], [0], [0], [1], [0, 0, 1, 1], [], []>} : vector<8x72xbf16>, vector<72x384xbf16>, vector<8x384xf32> -> vector<8x384xf32>
    %c0_29 = arith.constant 0 : index
    %c0_30 = arith.constant 0 : index
    %22 = vector.load %arg3[%c0_29, %c0_30] : memref<8x384xf32, #tpu.memory_space<vmem>>, vector<8x384xf32>
    %23 = arith.addf %21, %22 : vector<8x384xf32>
    %c0_31 = arith.constant 0 : index
    %c0_32 = arith.constant 0 : index
    %c0_33 = arith.constant 0 : index
    %24 = vector.load %arg4[%c0_31, %c0_32, %c0_33] : memref<1x8x384xf32, #tpu.memory_space<vmem>>, vector<1x8x384xf32>
    %25 = vector.shape_cast %24 : vector<1x8x384xf32> to vector<8x384xf32>
    %26 = vector.shape_cast %23 : vector<8x384xf32> to vector<1x8x384xf32>
    tpu.vector_store %arg4[%c0_31, %c0_32, %c0_33], %26 {strides = array<i32>} : memref<1x8x384xf32, #tpu.memory_space<vmem>>, vector<1x8x384xf32>,
    return
  }
  func.func @transform_0(%arg0: i32) -> (i32, i32, i32, i32) {
    %c0_i32 = arith.constant 0 : i32
    %c0_i32_0 = arith.constant 0 : i32
    %c0_i32_1 = arith.constant 0 : i32
    %c0_i32_2 = arith.constant 0 : i32
    return %arg0, %c0_i32, %c0_i32_0, %c0_i32_1 : i32, i32, i32, i32
  }
  func.func @transform_1(%arg0: i32) -> (i32, i32) {
    %c0_i32 = arith.constant 0 : i32
    %c0_i32_0 = arith.constant 0 : i32
    %c0_i32_1 = arith.constant 0 : i32
    return %c0_i32, %c0_i32_0 : i32, i32
  }
  func.func @transform_2(%arg0: i32) -> (i32, i32) {
    %c0_i32 = arith.constant 0 : i32
    %c0_i32_0 = arith.constant 0 : i32
    %c0_i32_1 = arith.constant 0 : i32
    return %c0_i32, %c0_i32_0 : i32, i32
  }
  func.func @transform_3(%arg0: i32) -> (i32, i32, i32) {
    %c0_i32 = arith.constant 0 : i32
    %c0_i32_0 = arith.constant 0 : i32
    %c0_i32_1 = arith.constant 0 : i32
    return %arg0, %c0_i32, %c0_i32_0 : i32, i32, i32
  }
}

</mosaic_0001>

<bundles_post_ra>
// kernel: tpu_custom_call.1
= control target key start
LH: loop header
LB: loop body
LE: loop exit
PB: predicated region body
PF: predicated region fallthrough
CT: control target
= control target key end

     0   :  { %8 = vsyncpa [#allocation3], 0  ;;  %s1092_s0 = inlined_call_operand.hbm [shape: f32[2,1,8,512], index: 0, kind: input, shape index: {}]   ;;  %s1093_s1 = inlined_call_operand.hbm [shape: bf16[8,72], index: 1, kind: input, shape index: {}]   ;;  %s1094_s2 = inlined_call_operand.hbm [shape: f32[8,384], index: 2, kind: input, shape index: {}]   ;;  %s1095_s3 = inlined_call_operand.hbm [shape: f32[2,8,384], index: 3, kind: output, shape index: {}]  }
   0x1   :  { %10 = vsyncpa [#allocation3 + $0x1], 0 }
   0x2   :  { %11 = vsyncpa [#allocation6], 0 }
   0x3   :  { %12 = vsyncpa [#allocation4], 0 }
   0x4   :  { %14 = vsyncpa [#allocation4 + $0x1], 0  ;;  %s899_s12 = smov 0   ;;  %s901_s13 = smov 0  }
   0x5   :  { %s903_s14 = smov 0   ;;  %s905_s15 = smov 0  }
   0x6 LB: > { %s920_s16 = sadd.s32 4294967295, %s867_s15   ;;  %s531_s17 = sadd.s32 4294967294, %s867_s15   ;;  %s867_s15 = sphi %s905_s15, %s1105_s15   ;;  %s863_s14 = sphi %s903_s14, %s1104_s14   ;;  %s859_s13 = sphi %s901_s13, %s1103_s13   ;;  %s855_s12 = sphi %s899_s12, %s1102_s12  }
   0x7   : > { %p40_p0 = scmp.ne.s32.totalorder %s859_s13, %s855_s12  ;;  %p41_p1 = scmp.eq.s32.totalorder %s920_s16, 0 }
   0x8   : > { %p106_p2 = scmp.eq.s32.totalorder %s920_s16, 1  ;;  %p112_p3 = scmp.eq.s32.totalorder %s531_s17, 1 }
   0x9   : > { %p929_p4 = por %p41_p1, %p40_p0  ;;  %p532_p5 = scmp.ge.s32.totalorder %s867_s15, 1 }
   0xa   : > { %p934_p6 = por %p112_p3, %p40_p0  ;;  %p119_p7 = scmp.lt.s32.totalorder %s867_s15, 3 }
   0xb   : > { %s131_s22 = sshll.u32 %s1093_s1, 4  ;;  %s869_s24 = smov [#allocation5]   ;;  %s132_s22 = int_to_ptr.hbm [resolvable:$true] %s131_s22 }
   0xc   : > { %p942_p8 = pnand %p532_p5, %p119_p7  ;;  %s133_s25 = sshll.u32 %s869_s24, 4  ;;  %s134_s25 = int_to_ptr.vmem [resolvable:$true] %s133_s25 }
   0xd   : > { %s143_s28 = sshll.u32 %s1094_s2, 4  ;;  %s870_s29 = smov [#allocation7]   ;;  %s144_s28 = int_to_ptr.hbm [resolvable:$true] %s143_s28 }
   0xe   : > { %p564_p10 = pneg %p942_p8  ;;  %s145_s30 = sshll.u32 %s870_s29, 4  ;;  %s146_s30 = int_to_ptr.vmem [resolvable:$true] %s145_s30 }
   0xf   : > { %s955_s4 = sadd.s32 1, %s867_s15   ;;  %s27_s5 = sadd.s32 1, %s863_s14 }
  0x10   : > { %p565_p11 = pnand %p564_p10, %p41_p1  ;;  %s24_s6 = ssub.s32 %s867_s15, %s955_s4 }
  0x11   : > { %p34_p12 = scmp.ne.s32.totalorder %s863_s14, %s859_s13  ;;  %p25_p13 = scmp.eq.s32.totalorder %s24_s6, 0 }
  0x12   : > { %567 = dma.hbm_to_vmem [thread:$0]  (!%p565_p11), %s132_s22, 64, %s134_s25, [#allocation6]  }
  0x13   : > { %570 = dma.hbm_to_vmem [thread:$0]  (!%p565_p11), %s144_s28, 384, %s146_s30, [#allocation6]  }
  0x14   : > { %p35_p0 = scmp.eq.s32.totalorder %s867_s15, 0  ;;  %p965_p3 = por %p106_p2, %p34_p12 }
  0x15   : > { %p581_p5 = scmp.lt.s32.totalorder %s867_s15, 2  ;;  %s156_s9 = sand.u32 1, %s863_s14  }
  0x16   : > { %s971_s8 = scalar_select %p25_p13, %s863_s14, %s27_s5  }
  0x17   : > { %p36_p7 = por %p35_p0, %p34_p12  ;;  %s536_s10 = sshll.u32 %s156_s9, 5 }
  0x18   : > { %s549_s11 = sshll.u32 %s867_s15, 5  ;;  %s160_s22 = scalar_lea.vmem [#allocation2], %s536_s10 }
  0x19   : > { %s165_s21 = scalar_lea.hbm %s1092_s0, %s549_s11  ;;  %s169_s24 = sshll.u32 %s160_s22, 4  ;;  %s170_s24 = int_to_ptr.vmem [resolvable:$true] %s169_s24 }
  0x1a   : > { %s167_s25 = sshll.u32 %s165_s21, 4  ;;  %p978_p2 = pnand %p581_p5, %p36_p7  ;;  %s168_s25 = int_to_ptr.hbm [resolvable:$true] %s167_s25 }
  0x1b   : > { %s157_s27 = scalar_lea.sflag [#allocation3], %s156_s9  ;;  %s767_s28 = sshra.s32 %s168_s25, 4  ;;  %s768_s28 = int_to_ptr.hbm [resolvable:$true] %s767_s28 }
  0x1c   : > { %s769_s29 = scalar_lea.hbm %s768_s28, 32  ;;  %p771_p11 = pneg %p978_p2 }
  0x1d   : > { %p770_p10 = scmp.ne.s32.totalorder %s768_s28, %s769_s29  ;;  %s774_s6 = scalar_lea.hbm %s1092_s0, 64 }
  0x1e   : > { %p775_p0 = scmp.lt.s32.totalorder %s768_s28, %s1092_s0  ;;  %p776_p5 = scmp.lt.s32.totalorder %s774_s6, %s769_s29 }
  0x1f   : > { %p772_p12 = pnand %p771_p11, %p770_p10 }
  0x20   : > { %p777_p7 = por %p776_p5, %p775_p0 }
  0x21   : > { %p773_p13 = pneg %p772_p12 }
  0x23   : > { %p778_p9 = pnand %p777_p7, %p773_p13 }
  0x25   : > { %781 = shalt.err (!%p778_p9)
}
  0x26   : > { %574 = dma.hbm_to_vmem [thread:$0]  (!%p978_p2), %s168_s25, 512, %s170_s24, %s157_s27  }
  0x27   : > { %178 = sbr.rel (%p942_p8) target bundleno = 347 (0x15b), region = 32  ;;  %s995_s9 = sand.u32 (!%p942_p8), 1, %s859_s13  }
  0x28   : > { %s540_s17 = sshll.u32 (!%p942_p8), %s995_s9, 5  ;;  %s181_s20 = scalar_lea.sflag (!%p942_p8), [#allocation3], %s995_s9 }
  0x29   : > { %s184_s21 = scalar_lea.vmem (!%p942_p8), [#allocation2], %s540_s17 }
  0x2c   : > { %842 = dma.done.wait (%p929_p4), %s181_s20, 512  }
  0x2d   : > { %844 = vsyncadd (%p929_p4), %s181_s20, 4294966784 }
  0x2e   : > { %846 = dma.done.wait (%p41_p1), [#allocation6], 448  }
  0x2f   : > { %848 = vsyncadd (%p41_p1), [#allocation6], 4294966848  ;;  %v1007_v0 = vld [vmem:[%s184_s21 + $0x10] sm:$0xff]  ;;  %v225_v1 = vld [vmem:[%s184_s21 + $0x18] sm:$0xff]  ;;  %s871_s23 = smov 91   ;;  %s872_s22 = smov 90  }
  0x30   : > { %v637_v2 = vpack.i.bf16 %v225_v1, %v1007_v0  ;;  %v1010_v3 = vld [vmem:[%s184_s21] sm:$0xff]  ;;  %v1012_v4 = vld [vmem:[%s184_s21 + $0x8] sm:$0xff]  ;;  %s873_s18 = smov 109   ;;  %s874_s24 = smov 92   ;;  %vm343_vm0 = vcmask 736256   ;;  %vm373_vm1 = vcmask 1043456  }
  0x31   : > { %v642_v5 = vpack.i.bf16 %v1012_v4, %v1010_v3  ;;  %s875_s25 = smov 108   ;;  %s876_s26 = smov 126   ;;  %vm313_vm2 = vcmask 752640   ;;  %vm328_vm3 = vcmask 744448   ;;  %vm283_vm4 = vcmask 891904  }
  0x32   : > { %638 = vrot.lane.b32.xlu1 %v637_v2, %s871_s23  ;;  %628 = vrot.lane.b32.xlu0 %v637_v2, %s872_s22  ;;  %s877_s27 = smov 110   ;;  %s878_s28 = smov 127   ;;  %vm298_vm5 = vcmask 883712   ;;  %vm253_vm6 = vcmask 1031168   ;;  %vm268_vm7 = vcmask 900096   ;;  %vm238_vm8 = vcmask 1039360  }
  0x33   : > { %648 = vrot.lane.b32.xlu2 %v637_v2, %s873_s18  ;;  %vm369_vm9 = vcmask 588800   ;;  %s551_s29 = smul.u32 24, %s920_s16  ;;  %s426_s16 = scalar_lea.sflag [#allocation4], %s995_s9 }
  0x34   : > { %s550_s30 = smul.u32 24, %s995_s9 }
  0x35   : > { %s437_s10 = scalar_lea.hbm %s1095_s3, %s551_s29 }
  0x36   : > { %s217_s11 = scalar_lea.vmem [#allocation8], %s550_s30  ;;  %s441_s20 = sshll.u32 %s437_s10, 4  ;;  %s442_s20 = int_to_ptr.hbm [resolvable:$true] %s441_s20 }
  0x37   : > { %s439_s17 = sshll.u32 %s217_s11, 4  ;;  %s811_s21 = sshra.s32 %s442_s20, 4  ;;  %s440_s17 = int_to_ptr.vmem [resolvable:$true] %s439_s17  ;;  %s812_s21 = int_to_ptr.hbm [resolvable:$true] %s811_s21 }
  0x38   : > { %p818_p9 = scmp.lt.s32.totalorder %s812_s21, %s1095_s3 }
  0x3a   : > { %633 = vrot.lane.b32.xlu0 %v637_v2, %s874_s24  ;;  %643 = vrot.lane.b32.xlu1 %v642_v5, %s872_s22 }
  0x3b   : > { %653 = vrot.lane.b32.xlu2 %v637_v2, %s875_s25 }
  0x42   : > { %658 = vrot.lane.b32.xlu0 %v642_v5, %s874_s24  ;;  %663 = vrot.lane.b32.xlu1 %v642_v5, %s871_s23  ;;  %s813_s23 = scalar_lea.hbm %s812_s21, 24  ;;  %s817_s24 = scalar_lea.hbm %s1095_s3, 48 }
  0x43   : > { %668 = vrot.lane.b32.xlu2 %v637_v2, %s876_s26  ;;  %p814_p1 = scmp.ne.s32.totalorder %s812_s21, %s813_s23  ;;  %p819_p2 = scmp.lt.s32.totalorder %s817_s24, %s813_s23 }
  0x45   : > { %p815_p4 = pnand %p814_p1, %p965_p3  ;;  %p820_p10 = por %p819_p2, %p818_p9 }
  0x47   : > { %p816_p8 = pneg %p815_p4 }
  0x49   : > { %p821_p11 = pnand %p820_p10, %p816_p8 }
  0x4a   : > { %673 = vrot.lane.b32.xlu0 %v637_v2, %s877_s27  ;;  %678 = vrot.lane.b32.xlu1 %v642_v5, %s873_s18 }
  0x4b   : > { %683 = vrot.lane.b32.xlu2 %v642_v5, %s875_s25 }
  0x52   : > { %688 = vrot.lane.b32.xlu0 %v637_v2, %s878_s28  ;;  %693 = vrot.lane.b32.xlu1 %v642_v5, %s876_s26 }
  0x53   : > { %698 = vrot.lane.b32.xlu2 %v642_v5, %s877_s27 }
  0x5a   : > { %703 = vrot.lane.b32.xlu0 %v642_v5, %s878_s28 }
  0x8d   : > { %v1016_v6 = vpop.permute.xlu2 %648 }
  0x8e   : > { %v651_v17 = vunpack.i.h.bf16 %v1016_v6  ;;  %v650_v18 = vunpack.i.l.bf16 %v1016_v6 }
  0x90   : > { %v286_v35 = vsel %vm283_vm4, %v650_v18, %v651_v17 }
  0x95   : > { %v1018_v7 = vpop.permute.xlu2 %653 }
  0x96   : > { %v656_v19 = vunpack.i.h.bf16 %v1018_v7  ;;  %v655_v20 = vunpack.i.l.bf16 %v1018_v7 }
  0x98   : > { %v301_v36 = vsel %vm298_vm5, %v655_v20, %v656_v19 }
  0x99   : > { %v359_v41 = vpack.c.bf16 %v301_v36, %v286_v35  ;;  %v368_v35 = vld [vmem:[#allocation7 + $0x10] sm:$0xff] }
  0x9d   : > { %v1026_v23 = vpop.permute.xlu2 %668 }
  0x9e   : > { %v671_v54 = vunpack.i.h.bf16 %v1026_v23  ;;  %v670_v55 = vunpack.i.l.bf16 %v1026_v23 }
  0xa0   : > { %v256_v1 = vsel %vm253_vm6, %v670_v55, %v671_v54 }
  0xa4   : > { %v639_v8 = vpop.permute.xlu1 %638  ;;  %v629_v9 = vpop.permute.xlu0 %628 }
  0xa5   : > { %v631_v10 = vunpack.i.h.bf16 %v629_v9  ;;  %v630_v11 = vunpack.i.l.bf16 %v629_v9  ;;  %v641_v15 = vunpack.i.h.bf16 %v639_v8  ;;  %v640_v16 = vunpack.i.l.bf16 %v639_v8  ;;  %v684_v46 = vpop.permute.xlu2 %683 }
  0xa6   : > { %v685_v51 = vunpack.i.l.bf16 %v684_v46  ;;  %v686_v56 = vunpack.i.h.bf16 %v684_v46 }
  0xa7   : > { %v346_v12 = vsel %vm343_vm0, %v630_v11, %v631_v10  ;;  %v331_v29 = vsel %vm328_vm3, %v640_v16, %v641_v15 }
  0xa8   : > { %v365_v13 = vpack.c.bf16 %v346_v12, %v346_v12  ;;  %v299_v59 = vsel %vm298_vm5, %v685_v51, %v686_v56  ;;  %v300_v6 = vsel %vm298_vm5, %v686_v56, %v655_v20 }
  0xaa   : > { %v381_v14 = vsel %vm373_vm1, %v365_v13, 0 }
  0xab   : > { %412 = vmatpush.bf16.msra.mxu2 %v381_v14 }
  0xac   : > { %v634_v21 = vpop.permute.xlu0 %633  ;;  %v644_v22 = vpop.permute.xlu1 %643 }
  0xad   : > { %v636_v24 = vunpack.i.h.bf16 %v634_v21  ;;  %v635_v25 = vunpack.i.l.bf16 %v634_v21  ;;  %v646_v26 = vunpack.i.h.bf16 %v644_v22  ;;  %v645_v27 = vunpack.i.l.bf16 %v644_v22  ;;  %v699_v2 = vpop.permute.xlu2 %698 }
  0xae   : > { %v700_v9 = vunpack.i.l.bf16 %v699_v2  ;;  %v701_v13 = vunpack.i.h.bf16 %v699_v2 }
  0xaf   : > { %v316_v28 = vsel %vm313_vm2, %v635_v25, %v636_v24  ;;  %v345_v30 = vsel %vm343_vm0, %v646_v26, %v630_v11  ;;  %v344_v31 = vsel %vm343_vm0, %v645_v27, %v646_v26 }
  0xb0   : > { %v362_v32 = vpack.c.bf16 %v331_v29, %v316_v28  ;;  %v364_v33 = vpack.c.bf16 %v345_v30, %v345_v30  ;;  %v363_v34 = vpack.c.bf16 %v344_v31, %v344_v31  ;;  %v350_v28 = vld [vmem:[#allocation5] sm:$0xf] }
  0xb2   : > { %413 = vmatpush.bf16.msra.mxu2 %v362_v32  ;;  %v378_v37 = vsel %vm373_vm1, %v364_v33, 0  ;;  %v375_v38 = vsel %vm373_vm1, %v363_v34, 0 }
  0xb3   : > { %399 = vmatpush.bf16.msra.mxu1 %v378_v37  ;;  %386 = vmatpush.bf16.msra.mxu0 %v375_v38  ;;  %v366_v37 = vld [vmem:[#allocation7] sm:$0xff]  ;;  %v367_v38 = vld [vmem:[#allocation7 + $0x8] sm:$0xff] }
  0xb4   : > { %v659_v39 = vpop.permute.xlu0 %658  ;;  %v664_v40 = vpop.permute.xlu1 %663 }
  0xb5   : > { %v661_v42 = vunpack.i.h.bf16 %v659_v39  ;;  %v660_v43 = vunpack.i.l.bf16 %v659_v39  ;;  %v666_v44 = vunpack.i.h.bf16 %v664_v40  ;;  %v665_v45 = vunpack.i.l.bf16 %v664_v40 }
  0xb6   : > { %414 = vmatpush.bf16.msra.mxu2 %v359_v41 }
  0xb7   : > { %v314_v47 = vsel %vm313_vm2, %v660_v43, %v661_v42  ;;  %v329_v48 = vsel %vm328_vm3, %v665_v45, %v666_v44  ;;  %v315_v49 = vsel %vm313_vm2, %v661_v42, %v635_v25  ;;  %v330_v50 = vsel %vm328_vm3, %v666_v44, %v640_v16 }
  0xb8   : > { %v360_v52 = vpack.c.bf16 %v329_v48, %v314_v47  ;;  %v361_v53 = vpack.c.bf16 %v330_v50, %v315_v49  ;;  %v269_v16 = vsel %vm268_vm7, %v700_v9, %v701_v13 }
  0xba   : > { %387 = vmatpush.bf16.msra.mxu0 %v360_v52  ;;  %400 = vmatpush.bf16.msra.mxu1 %v361_v53 }
  0xbc   : > { %v674_v57 = vpop.permute.xlu0 %673  ;;  %v679_v58 = vpop.permute.xlu1 %678 }
  0xbd   : > { %v676_v60 = vunpack.i.h.bf16 %v674_v57  ;;  %v675_v61 = vunpack.i.l.bf16 %v674_v57  ;;  %v681_v62 = vunpack.i.h.bf16 %v679_v58  ;;  %v680_v63 = vunpack.i.l.bf16 %v679_v58 }
  0xbf   : > { %v285_v5 = vsel %vm283_vm4, %v681_v62, %v650_v18  ;;  %v271_v7 = vsel %vm268_vm7, %v675_v61, %v676_v60  ;;  %v284_v8 = vsel %vm283_vm4, %v680_v63, %v681_v62  ;;  %v270_v22 = vsel %vm268_vm7, %v701_v13, %v675_v61 }
  0xc0   : > { %v358_v10 = vpack.c.bf16 %v300_v6, %v285_v5  ;;  %v356_v11 = vpack.c.bf16 %v271_v7, %v256_v1  ;;  %v357_v12 = vpack.c.bf16 %v299_v59, %v284_v8 }
  0xc2   : > { %401 = vmatpush.bf16.msra.mxu1 %v358_v10  ;;  %415 = vmatpush.bf16.msra.mxu2 %v356_v11 }
  0xc3   : > { %388 = vmatpush.bf16.msra.mxu0 %v357_v12 }
  0xc4   : > { %v689_v14 = vpop.permute.xlu0 %688  ;;  %v694_v15 = vpop.permute.xlu1 %693 }
  0xc5   : > { %v691_v17 = vunpack.i.h.bf16 %v689_v14  ;;  %v690_v18 = vunpack.i.l.bf16 %v689_v14  ;;  %v696_v19 = vunpack.i.h.bf16 %v694_v15  ;;  %v695_v20 = vunpack.i.l.bf16 %v694_v15 }
  0xc7   : > { %v255_v21 = vsel %vm253_vm6, %v696_v19, %v670_v55  ;;  %v241_v23 = vsel %vm238_vm8, %v690_v18, %v691_v17  ;;  %v254_v24 = vsel %vm253_vm6, %v695_v20, %v696_v19 }
  0xc8   : > { %v355_v25 = vpack.c.bf16 %v270_v22, %v255_v21  ;;  %v353_v26 = vpack.c.bf16 %v241_v23, %v1007_v0  ;;  %v354_v27 = vpack.c.bf16 %v269_v16, %v254_v24 }
  0xca   : > { %402 = vmatpush.bf16.msra.mxu1 %v355_v25  ;;  %416 = vmatpush.bf16.msra.mxu2 %v353_v26 }
  0xcb   : > { %389 = vmatpush.bf16.msra.mxu0 %v354_v27 }
  0xcc   : > { %v704_v29 = vpop.permute.xlu0 %703 }
  0xcd   : > { %v706_v30 = vunpack.i.h.bf16 %v704_v29  ;;  %v705_v31 = vunpack.i.l.bf16 %v704_v29  ;;  %545 = vmatmul.msk.bf16.vlgmr.msra.gmra.mxu2 %vm369_vm9, %v350_v28 }
  0xcf   : > { %v239_v32 = vsel %vm238_vm8, %v705_v31, %v706_v30  ;;  %v240_v33 = vsel %vm238_vm8, %v706_v30, %v690_v18 }
  0xd0   : > { %v351_v34 = vpack.c.bf16 %v239_v32, %v1010_v3  ;;  %v352_v0 = vpack.c.bf16 %v240_v33, %v1012_v4 }
  0xd2   : > { %390 = vmatpush.bf16.msra.mxu0 %v351_v34  ;;  %403 = vmatpush.bf16.msra.mxu1 %v352_v0 }
  0xd5   : > { %543 = vmatmul.msk.bf16.vlgmr.msra.gmra.mxu0 %vm369_vm9, %v350_v28  ;;  %544 = vmatmul.msk.bf16.vlgmr.msra.gmra.mxu1 %vm369_vm9, %v350_v28 }
 0x150   : > { %v418_v36 = vpop.f32.mrf.mxu2 }
 0x151   : > { %v419_v39 = vadd.f32 %v418_v36, %v368_v35 }
 0x152   : > { %v392_v3 = vpop.f32.mrf.mxu0  ;;  %v405_v4 = vpop.f32.mrf.mxu1 }
 0x153   : > { %424 = vst [vmem:[%s217_s11 + $0x10] sm:$0xff] %v419_v39  ;;  %v393_v40 = vadd.f32 %v392_v3, %v366_v37  ;;  %v406_v41 = vadd.f32 %v405_v4, %v367_v38 }
 0x155   : > { %422 = vst [vmem:[%s217_s11] sm:$0xff] %v393_v40 }
 0x156   : > { %423 = vst [vmem:[%s217_s11 + $0x8] sm:$0xff] %v406_v41 }
 0x157   : > { %824 = shalt.err (!%p821_p11)
}
 0x158   : > { %562 = dma.vmem_to_hbm [thread:$0]  (%p965_p3), %s440_s17, 384, %s442_s20, %s426_s16   ;;  %v420_v42 = vpop.f32.mrf.mxu2 }
 0x15a   : > { %v394_v43 = vpop.f32.mrf.mxu0  ;;  %v407_v44 = vpop.f32.mrf.mxu1 }
 0x15b PF: > { %s453_s9 = sand.u32 1, %s855_s12   ;;  %p1101_p12 = scmp.ge.s32.totalorder %s867_s15, 2 }
 0x15c   : > { %s454_s27 = scalar_lea.sflag [#allocation4], %s453_s9 }
 0x15d   : > { %p576_p13 = pnand %p1101_p12, %p934_p6 }
 0x15f   : > { %p577_p0 = pneg %p576_p13 }
 0x161   : > { %850 = dma.done.wait (%p577_p0), %s454_s27, 384  }
 0x162   : > { %852 = vsyncadd (%p577_p0), %s454_s27, 4294966912  ;;  %p17_p3 = scmp.ge.s32.totalorder %s955_s4, 4   ;;  %s1102_s12 = smov %s859_s13 }
 0x163   : > { %s1103_s13 = smov %s863_s14  ;;  %s1104_s14 = smov %s971_s8 }
 0x164   : > { %s1105_s15 = smov %s955_s4  ;;  %19 = sbr.rel (!%p17_p3) target bundleno = 6 (0x6), region = 85 }
 0x169   :  { %460 = vsyncpa [#allocation3], 1 }
 0x16a   :  { %462 = vsyncpa [#allocation3 + $0x1], 1 }
 0x16b   :  { %463 = vsyncpa [#allocation6], 1 }
 0x16c   :  { %464 = vsyncpa [#allocation4], 1 }
 0x16d   :  { %466 = vsyncpa [#allocation4 + $0x1], 1 }

</bundles_post_ra>
